<compile_context>
chip_gen: v5e
topology: v5e:2x2
jax: 0.10.0
libtpu: 0.0.40
codegen_flags: <defaults>
</compile_context>

<pallas_src>
import numpy as np
import jax
import jax.numpy as jnp
from jax.experimental import pallas as pl
from jax.experimental.pallas import tpu as pltpu


def _gelu(v):
    # TODO(synk): PyTorch nn.GELU default is the exact erf-based GELU; the tanh
    # approximation is used since erf lowering in Mosaic is not guaranteed.
    return 0.5 * v * (1.0 + jnp.tanh(0.7978845608028654 * (v + 0.044715 * v * v * v)))


# ----------------------------------------------------------------------------
# Roll-direction probe: makes the kernel robust to either rotate convention.
# ----------------------------------------------------------------------------
_ROLL_SIGN_CACHE = []


def _lane_roll_sign():
    """Returns +1 if pltpu.roll(x, k)[i] == x[(i + k) % n], else -1 (np.roll)."""
    if not _ROLL_SIGN_CACHE:
        def probe(x_ref, o_ref):
            o_ref[...] = pltpu.roll(x_ref[...], 1, 1)

        x = jax.lax.broadcasted_iota(jnp.float32, (8, 128), 1)
        out = pl.pallas_call(
            probe, out_shape=jax.ShapeDtypeStruct((8, 128), jnp.float32))(x)
        _ROLL_SIGN_CACHE.append(1 if float(out[0, 0]) == 1.0 else -1)
    return _ROLL_SIGN_CACHE[0]


# ----------------------------------------------------------------------------
# Host-side prep: separable depthwise-conv masks/shifts + folded 1x1 weights.
# ----------------------------------------------------------------------------
def _sep_masks_shifts(K, dil, pad, H, W, roll_sign):
    """Separable factorization of a KxK depthwise conv: K row masks/shifts and
    K col masks/shifts (instead of K*K weight*mask planes)."""
    HW = H * W
    q = np.arange(HW)
    r, c = q // W, q % W
    rowmask = np.zeros((K, 1, HW), np.float32)
    colmask = np.zeros((K, 1, HW), np.float32)
    rshift, cshift = [], []
    for t in range(K):
        d = t * dil - pad
        rowmask[t, 0] = ((r + d >= 0) & (r + d < H)).astype(np.float32)
        colmask[t, 0] = ((c + d >= 0) & (c + d < W)).astype(np.float32)
        rshift.append(int((roll_sign * d * W) % HW))     # want src[q + d*W]
        cshift.append(int((roll_sign * d) % HW))         # want src[q + d]
    return rowmask, colmask, tuple(rshift), tuple(cshift)


def _dw_weight_cols(w, G):
    """(K, K, C) depthwise weights -> (G*C, K*K), column index = i*K + j."""
    w = np.asarray(w, np.float32)
    K, _, C = w.shape
    cols = np.transpose(w, (2, 0, 1)).reshape(C, K * K)
    return np.tile(cols, (G, 1))


# bias-column indices inside the packed (G*C, 8) / (G*HD, 2) bias arrays
BC_P1, BC_F, BC_G, BC_P2, BC_CS1, BC_C0, BC_SP, BC_FC2 = range(8)
BH_FC1, BH_DW = range(2)


def prepare_kernel_params(p, H, W, G):
    """Fold BN / layer-scales / attn shortcut into the 1x1 weights, block-
    diagonalize the 1x1 convs over the G batch-folded images, and build the
    separable depthwise-conv masks + per-channel tap weights."""
    roll_sign = _lane_roll_sign()
    f = lambda a: np.asarray(a, np.float32)
    C = p["w_p1"].shape[0]
    eye = np.eye(G, dtype=np.float32)
    blk = lambda w: np.kron(eye, f(w))                   # block-diag over images
    til = lambda v: np.tile(f(v), G)                     # per-channel -> per-row

    w_p1, b_p1 = f(p["w_p1"]), f(p["b_p1"])
    bn1_s, bn1_b = f(p["bn1_s"]), f(p["bn1_b"])
    bn2_s, bn2_b = f(p["bn2_s"]), f(p["bn2_b"])
    ls1, ls2 = f(p["ls1"]), f(p["ls2"])
    w_c1, b_c1 = f(p["w_c1"]), f(p["b_c1"])
    w_p2, b_p2 = f(p["w_p2"]), f(p["b_p2"])
    w_fc1, b_fc1 = f(p["w_fc1"]), f(p["b_fc1"])
    w_fc2, b_fc2 = f(p["w_fc2"]), f(p["b_fc2"])

    # norm1 folded into proj_1
    w_p1k = w_p1 * bn1_s[None, :]
    b_p1k = w_p1 @ bn1_b + b_p1
    # layer_scale_1, proj_2 bias and the BN'd attention shortcut folded together
    w_p2k = ls1[:, None] * w_p2
    b_p2k = ls1 * (b_p2 + bn1_b)
    cs1 = 1.0 + ls1 * bn1_s                              # residual scale on x
    # norm2 folded into fc1, layer_scale_2 folded into fc2
    w_fc1k = w_fc1 * bn2_s[None, :]
    b_fc1k = w_fc1 @ bn2_b + b_fc1
    w_fc2k = ls2[:, None] * w_fc2
    b_fc2k = ls2 * b_fc2

    # lane-packed bias columns (all reads are static, sublane-aligned slices)
    bc = np.stack([til(b_p1k), til(b_c1[:C]), til(b_c1[C:]), til(b_p2k),
                   til(cs1), til(p["b_c0"]), til(p["b_sp"]), til(b_fc2k)],
                  axis=1)                                # (G*C, 8)
    bh = np.stack([til(b_fc1k), til(p["b_dw"])], axis=1)  # (G*HD, 2)

    rm0, cm0, rs0, cs0 = _sep_masks_shifts(5, 1, 2, H, W, roll_sign)   # dw 5x5
    rms, cms, rss, css = _sep_masks_shifts(7, 3, 9, H, W, roll_sign)   # dw 7x7 d3
    rmd, cmd, rsd, csd = _sep_masks_shifts(3, 1, 1, H, W, roll_sign)   # dw 3x3

    arrays = [blk(w_p1k), blk(w_c1[:C]), blk(w_c1[C:]), blk(w_p2k),
              blk(w_fc1k), blk(w_fc2k),
              _dw_weight_cols(p["w_c0"], G), rm0, cm0,
              _dw_weight_cols(p["w_sp"], G), rms, cms,
              _dw_weight_cols(p["w_dw"], G), rmd, cmd,
              bc, bh]
    arrays = [jnp.asarray(a, jnp.float32) for a in arrays]
    shifts = dict(c0=(rs0, cs0), sp=(rss, css), dw=(rsd, csd))
    return arrays, shifts


# ----------------------------------------------------------------------------
# Kernel
# ----------------------------------------------------------------------------
def _make_kernel(GC, GHD, HW, shifts):
    rs0, cs0 = shifts["c0"]
    rss, css = shifts["sp"]
    rsd, csd = shifts["dw"]

    def kernel(x_ref, wp1_ref, wf_ref, wg_ref, wp2_ref, wfc1_ref, wfc2_ref,
               wq0_ref, rm0_ref, cm0_ref, wqs_ref, rms_ref, cms_ref,
               wqd_ref, rmd_ref, cmd_ref, bc_ref, bh_ref, o_ref):
        x = x_ref[...].astype(jnp.float32)               # (GC, HW), lane-dense

        def bias(b_ref, k):
            return b_ref[:, k:k + 1]                     # static slice -> (n, 1)

        def mm(w_ref, xin, b):
            return jnp.dot(w_ref[...], xin,
                           preferred_element_type=jnp.float32) + b

        def dconv(src, wq_ref, rm_ref, cm_ref, b, rsh, csh):
            # Separable depthwise conv: K row rolls + K col rolls (XLU) instead
            # of K*K full-offset rolls; tap weights are (nch,1) lane broadcasts.
            K = len(rsh)
            rowed = []
            for i, s in enumerate(rsh):
                t = src if s == 0 else pltpu.roll(src, s, 1)
                rowed.append(t * rm_ref[i])              # (1,HW) sublane bcast
            acc = [None, None]                           # 2 accumulator chains
            for j, s in enumerate(csh):
                part = [None, None]                      # 2 inner partial sums
                for i in range(K):
                    col = i * K + j
                    term = wq_ref[:, col:col + 1] * rowed[i]
                    k = i & 1
                    part[k] = term if part[k] is None else part[k] + term
                t = part[0] if part[1] is None else part[0] + part[1]
                t = t if s == 0 else pltpu.roll(t, s, 1)
                t = cm_ref[j] * t
                k = j & 1
                acc[k] = t if acc[k] is None else acc[k] + t
            out = acc[0] if acc[1] is None else acc[0] + acc[1]
            return out + b

        # ---- SpatialAttention branch (norm1 / layer_scale_1 pre-folded) ----
        y = _gelu(mm(wp1_ref, x, bias(bc_ref, BC_P1)))
        a = dconv(y, wq0_ref, rm0_ref, cm0_ref, bias(bc_ref, BC_C0), rs0, cs0)
        a = dconv(a, wqs_ref, rms_ref, cms_ref, bias(bc_ref, BC_SP), rss, css)
        f = mm(wf_ref, a, bias(bc_ref, BC_F))
        g = mm(wg_ref, a, bias(bc_ref, BC_G))
        gate = f * jax.nn.sigmoid(g)
        x2 = bias(bc_ref, BC_CS1) * x + mm(wp2_ref, gate, bias(bc_ref, BC_P2))

        # ---- MixMlp branch (norm2 / layer_scale_2 pre-folded) ----
        h = mm(wfc1_ref, x2, bias(bh_ref, BH_FC1))
        hd = dconv(h, wqd_ref, rmd_ref, cmd_ref, bias(bh_ref, BH_DW), rsd, csd)
        out = x2 + mm(wfc2_ref, _gelu(hd), bias(bc_ref, BC_FC2))

        o_ref[...] = out.astype(o_ref.dtype)

    return kernel


def gasubblock_forward(x_nchw, p):
    """x_nchw: (N, C, H, W) float32 in the PyTorch NCHW layout."""
    N, C, H, W = x_nchw.shape
    HD = p["w_fc1"].shape[0]
    HW = H * W

    # Batch fold: pack G images into the sublanes of one block so the
    # (G*C, HW) f32 tiles fill full (8,128) vregs and the grid shrinks.
    G = min(N, max(1, 8 // max(C, 1)))
    while N % G:
        G -= 1
    GC, GHD = G * C, G * HD
    n_blocks = N // G
    # TODO(synk): on v7x prefer n_blocks >= 2 (smaller G) so the "parallel"
    # grid axis can shard onto both TensorCores; at N=2 the sublane fill wins.

    arrays, shifts = prepare_kernel_params(p, H, W, G)
    kernel = _make_kernel(GC, GHD, HW, shifts)

    def const_spec(a):
        return pl.BlockSpec(a.shape, lambda b, nd=a.ndim: (0,) * nd)

    out = pl.pallas_call(
        kernel,
        out_shape=jax.ShapeDtypeStruct((N * C, HW), x_nchw.dtype),
        grid=(n_blocks,),
        in_specs=[pl.BlockSpec((GC, HW), lambda b: (b, 0))]
                 + [const_spec(a) for a in arrays],
        out_specs=pl.BlockSpec((GC, HW), lambda b: (b, 0)),
        compiler_params=pltpu.CompilerParams(
            dimension_semantics=("parallel",)),
    )(x_nchw.reshape(N * C, HW), *arrays)
    return out.reshape(N, C, H, W)


# ----------------------------------------------------------------------------
# Deterministic parameter construction (unfused, module-style shapes)
# ----------------------------------------------------------------------------
def init_params(key, C, HD):
    keys = iter(jax.random.split(key, 48))
    eps = 1e-5

    def nrm(shape, std):
        return (std * jax.random.normal(next(keys), shape)).astype(jnp.float32)

    def bn_fold():
        gamma = 1.0 + 0.1 * jax.random.normal(next(keys), (C,))
        beta = 0.1 * jax.random.normal(next(keys), (C,))
        r_mean = 0.1 * jax.random.normal(next(keys), (C,))
        r_var = 1.0 + 0.1 * jnp.abs(jax.random.normal(next(keys), (C,)))
        scale = gamma / jnp.sqrt(r_var + eps)
        shift = beta - r_mean * scale
        return scale.astype(jnp.float32), shift.astype(jnp.float32)

    p = {}
    p["bn1_s"], p["bn1_b"] = bn_fold()
    p["w_p1"] = nrm((C, C), np.sqrt(2.0 / C));            p["b_p1"] = nrm((C,), 0.02)
    p["w_c0"] = nrm((5, 5, C), np.sqrt(2.0 / 25.0));      p["b_c0"] = nrm((C,), 0.02)
    p["w_sp"] = nrm((7, 7, C), np.sqrt(2.0 / 49.0));      p["b_sp"] = nrm((C,), 0.02)
    p["w_c1"] = nrm((2 * C, C), np.sqrt(2.0 / (2 * C)));  p["b_c1"] = nrm((2 * C,), 0.02)
    p["w_p2"] = nrm((C, C), np.sqrt(2.0 / C));            p["b_p2"] = nrm((C,), 0.02)
    p["ls1"] = 0.01 * jnp.ones((C,), jnp.float32)
    p["bn2_s"], p["bn2_b"] = bn_fold()
    p["w_fc1"] = nrm((HD, C), np.sqrt(2.0 / HD));         p["b_fc1"] = nrm((HD,), 0.02)
    p["w_dw"] = nrm((3, 3, HD), np.sqrt(2.0 / 9.0));      p["b_dw"] = nrm((HD,), 0.02)
    p["w_fc2"] = nrm((C, HD), np.sqrt(2.0 / C));          p["b_fc2"] = nrm((C,), 0.02)
    p["ls2"] = 0.01 * jnp.ones((C,), jnp.float32)
    return p


# ----------------------------------------------------------------------------
# Pure-JAX reference (unfused params, NCHW), for verification
# ----------------------------------------------------------------------------
def _pw_ref(x, w, b):
    return jnp.einsum("nchw,oc->nohw", x, w) + b.reshape(1, -1, 1, 1)


def _dw_ref(x, w, b, dilation, padding):
    ch = x.shape[1]
    w_oihw = jnp.transpose(w, (2, 0, 1))[:, None]   # (ch, 1, K, K)
    y = jax.lax.conv_general_dilated(
        x, w_oihw, window_strides=(1, 1),
        padding=[(padding, padding), (padding, padding)],
        rhs_dilation=(dilation, dilation),
        dimension_numbers=("NCHW", "OIHW", "NCHW"),
        feature_group_count=ch)
    return y + b.reshape(1, -1, 1, 1)


def reference(x, p):
    C = x.shape[1]

    def bn(v, s, b):
        return v * s.reshape(1, -1, 1, 1) + b.reshape(1, -1, 1, 1)

    # attention branch (SpatialAttention has attn_shortcut=True)
    t = bn(x, p["bn1_s"], p["bn1_b"])
    y = _gelu(_pw_ref(t, p["w_p1"], p["b_p1"]))
    a = _dw_ref(y, p["w_c0"], p["b_c0"], 1, 2)
    a = _dw_ref(a, p["w_sp"], p["b_sp"], 3, 9)
    fg = _pw_ref(a, p["w_c1"], p["b_c1"])
    f, g = fg[:, :C], fg[:, C:]
    gated = jax.nn.sigmoid(g) * f
    attn = _pw_ref(gated, p["w_p2"], p["b_p2"]) + t
    x2 = x + p["ls1"].reshape(1, -1, 1, 1) * attn
    # MLP branch
    t2 = bn(x2, p["bn2_s"], p["bn2_b"])
    h = _pw_ref(t2, p["w_fc1"], p["b_fc1"])
    h = _dw_ref(h, p["w_dw"], p["b_dw"], 1, 1)
    m = _pw_ref(_gelu(h), p["w_fc2"], p["b_fc2"])
    return x2 + p["ls2"].reshape(1, -1, 1, 1) * m


if __name__ == "__main__":
    N, C, H, W = 2, 4, 16, 16            # NCHW, matches the PyTorch module input
    HD = int(C * 4.0)                    # mlp_ratio = 4.0

    key = jax.random.PRNGKey(0)
    kx, kp = jax.random.split(key)
    x = jax.random.normal(kx, (N, C, H, W), dtype=jnp.float32)
    params = init_params(kp, C, HD)

    out = gasubblock_forward(x, params)
    out = jax.block_until_ready(out)

    ref = jax.block_until_ready(reference(x, params))
    np.testing.assert_allclose(np.asarray(out), np.asarray(ref), rtol=2e-3, atol=2e-3)

    print("KERNEL_OK")
</pallas_src>

<mosaic_0001>
module attributes {stable_mosaic.version = 11 : i64} {
  func.func @probe(%arg0: memref<8x128xf32, #tpu.memory_space<vmem>>, %arg1: memref<8x128xf32, #tpu.memory_space<vmem>>) attributes {dimension_semantics = [], scalar_prefetch = 0 : i64, scratch_operands = 0 : i64, tpu.core_type = #tpu.core_type<tc>} {
    %c0 = arith.constant 0 : index
    %c0_0 = arith.constant 0 : index
    %0 = vector.load %arg0[%c0, %c0_0] : memref<8x128xf32, #tpu.memory_space<vmem>>, vector<8x128xf32>
    %c1_i32 = arith.constant 1 : i32
    %1 = tpu.dynamic_rotate %0 by %c1_i32 dim 1 : vector<8x128xf32>, i32 -> vector<8x128xf32>
    %c0_1 = arith.constant 0 : index
    %c0_2 = arith.constant 0 : index
    %2 = vector.load %arg1[%c0_1, %c0_2] : memref<8x128xf32, #tpu.memory_space<vmem>>, vector<8x128xf32>
    tpu.vector_store %arg1[%c0_1, %c0_2], %1 {strides = array<i32>} : memref<8x128xf32, #tpu.memory_space<vmem>>, vector<8x128xf32>,
    return
  }
}

</mosaic_0001>

<bundles_post_ra>
// kernel: tpu_custom_call.1
= control target key start
LH: loop header
LB: loop body
LE: loop exit
PB: predicated region body
PF: predicated region fallthrough
CT: control target
= control target key end

     0   :  { %6 = vsyncpa [#allocation3], 0  ;;  %s118_s0 = inlined_call_operand.hbm [shape: f32[8,128], index: 0, kind: input, shape index: {}]   ;;  %s119_s1 = inlined_call_operand.hbm [shape: f32[8,128], index: 1, kind: output, shape index: {}]  }
   0x1   :  { %7 = vsyncpa [#allocation4], 0  ;;  %s13_s8 = sshll.u32 %s118_s0, 4  ;;  %s99_s9 = smov [#allocation2]   ;;  %s14_s8 = int_to_ptr.hbm [resolvable:$true] %s13_s8 }
   0x2   :  { %s15_s10 = sshll.u32 %s99_s9, 4  ;;  %s16_s10 = int_to_ptr.vmem [resolvable:$true] %s15_s10 }
   0x3   :  { %18 = dma.hbm_to_vmem [thread:$0]  %s14_s8, 128, %s16_s10, [#allocation3]  }
   0x4   :  { %95 = dma.done.wait [#allocation3], 128  }
   0x5   :  { %96 = vsyncadd [#allocation3], 4294967168  ;;  %v23_v0 = vld [vmem:[#allocation2] sm:$0xff]  ;;  %s100_s11 = smov 1   ;;  %s101_s12 = smov [#allocation5]  }
   0x6   :  { %24 = vrot.lane.b32.xlu0 %v23_v0, %s100_s11  ;;  %s32_s13 = sshll.u32 %s101_s12, 4  ;;  %s34_s16 = sshll.u32 %s119_s1, 4  ;;  %s33_s13 = int_to_ptr.vmem [resolvable:$true] %s32_s13  ;;  %s35_s16 = int_to_ptr.hbm [resolvable:$true] %s34_s16 }
  0x78   :  { %v25_v1 = vpop.permute.xlu0 %24 }
  0x79   :  { %26 = vst [vmem:[#allocation5] sm:$0xff] %v25_v1 }
  0x7a   :  { %37 = dma.vmem_to_hbm [thread:$0]  %s33_s13, 128, %s35_s16, [#allocation4]  }
  0x7b   :  { %97 = dma.done.wait [#allocation4], 128  }
  0x7c   :  { %98 = vsyncadd [#allocation4], 4294967168 }
  0x7d   :  { %42 = vsyncpa [#allocation3], 1 }
  0x7e   :  { %43 = vsyncpa [#allocation4], 1 }

</bundles_post_ra>
